<compile_context>
chip_gen: v6e
topology: v6e:2x2x1
jax: 0.10.0
libtpu: 0.0.40
codegen_flags: <defaults>
</compile_context>

<pallas_src>
import jax
import jax.numpy as jnp
from jax.experimental import pallas as pl
from jax.experimental.pallas import tpu as pltpu


def time_embedding_kernel(x_ref, params_ref, o_ref):
    # x_ref      : (Bt, 1)
    # params_ref : (D+3, D)  rows [0:D]=W2, row D=W1, row D+1=b1, row D+2=b2
    # o_ref      : (Bt, D)
    D = o_ref.shape[-1]

    x = x_ref[...]                       # (Bt, 1)
    w1 = params_ref[D:D + 1, :]          # (1, D)
    b1 = params_ref[D + 1:D + 2, :]      # (1, D)
    b2 = params_ref[D + 2:D + 3, :]      # (1, D)

    # First linear: K=1 contraction == outer product == VPU broadcast mul-add.
    h = x * w1 + b1                      # (Bt, D)

    # Mish(h) = h * tanh(softplus(h)) = h * n / (n + 2), n = e*(e+2), e = exp(h).
    # Single exp (EUP) + one approx reciprocal (EUP) + Newton refinement (VPU).
    hc = jnp.minimum(h, 20.0)            # overflow guard: exp stays finite
    e = jnp.exp(hc)
    n = e * (e + 2.0)
    d = n + 2.0
    inv = pl.reciprocal(d, approx=True)
    inv = inv * (2.0 - d * inv)          # one Newton step -> ~f32 precision
    mish = jnp.where(h > 20.0, h, h * n * inv)   # mish(h) ~= h for large h

    # Second linear: (Bt,D) @ (D,D) -> (Bt,D) on the MXU (single push).
    w2 = params_ref[0:D, :]              # (D, D)
    y = jnp.dot(mish, w2, preferred_element_type=jnp.float32) + b2
    o_ref[...] = y.astype(o_ref.dtype)


def _pick_batch_tile(B, max_tile=512):
    """Largest multiple of 8 that divides B and is <= max_tile, else B."""
    if B <= max_tile:
        return B
    bt = (max_tile // 8) * 8
    while bt >= 8:
        if B % bt == 0:
            return bt
        bt -= 8
    return B


def time_embedding(x, w1, b1, w2, b2):
    """x: (B, 1); w1: (1, D); b1: (D,); w2: (D, D); b2: (D,) -> (B, D)"""
    B = x.shape[0]
    D = w2.shape[1]

    # Pack all parameters into one contiguous operand -> a single input DMA.
    #   rows [0:D]   : W2              (D, D)
    #   row  D       : W1              (1, D)
    #   row  D+1     : b1              (1, D)
    #   row  D+2     : b2              (1, D)
    params = jnp.concatenate(
        [w2, w1.reshape(1, D), b1.reshape(1, D), b2.reshape(1, D)], axis=0
    ).astype(jnp.float32)                # (D+3, D)

    # Batch tiling: single block for small B; grid over batch (multiple of 8,
    # <= 512 rows per tile) when B scales, marked "parallel" for megacore.
    bt = _pick_batch_tile(B)
    grid_b = B // bt

    # Accurate (tiny) cost estimate so XLA can hide this dispatch-bound call.
    flops = 2 * B * D * D + 10 * B * D
    transcendentals = 2 * B * D
    bytes_accessed = 4 * ((D + 3) * D + B + B * D)

    # NOTE: output last dim (D) is lane-narrow for small D; consumer-side
    # fusion or a lane-dense layout would be the next lever if D/B scale.
    return pl.pallas_call(
        time_embedding_kernel,
        out_shape=jax.ShapeDtypeStruct((B, D), jnp.float32),
        grid=(grid_b,),
        in_specs=[
            pl.BlockSpec((bt, 1), lambda i: (i, 0)),
            pl.BlockSpec((D + 3, D), lambda i: (0, 0)),
        ],
        out_specs=pl.BlockSpec((bt, D), lambda i: (i, 0)),
        compiler_params=pltpu.CompilerParams(
            dimension_semantics=("parallel",)),
        cost_estimate=pl.CostEstimate(
            flops=flops,
            transcendentals=transcendentals,
            bytes_accessed=bytes_accessed),
    )(x, params)


def _reference(x, w1, b1, w2, b2):
    h = jnp.dot(x, w1, precision="highest") + b1
    h = h * jnp.tanh(jax.nn.softplus(h))
    return jnp.dot(h, w2, precision="highest") + b2


if __name__ == "__main__":
    dim = 32   # hidden size of the TimeEmbedding MLP
    B = 8      # batch of timesteps

    key = jax.random.PRNGKey(0)
    kx, k1, k2, k3, k4 = jax.random.split(key, 5)

    # Deterministic "PyTorch-like" init (uniform in +/- 1/sqrt(fan_in)).
    x = jax.random.normal(kx, (B, 1), dtype=jnp.float32)
    w1 = jax.random.uniform(k1, (1, dim), jnp.float32, -1.0, 1.0)          # fan_in = 1
    b1 = jax.random.uniform(k2, (dim,), jnp.float32, -1.0, 1.0)
    bound = 1.0 / jnp.sqrt(jnp.float32(dim))
    w2 = jax.random.uniform(k3, (dim, dim), jnp.float32, -bound, bound)
    b2 = jax.random.uniform(k4, (dim,), jnp.float32, -bound, bound)

    out = time_embedding(x, w1, b1, w2, b2)
    out = jax.block_until_ready(out)

    ref = _reference(x, w1, b1, w2, b2)
    assert out.shape == (B, dim)
    # 1e-4 tolerance: covers ulp-level differences between the single-exp Mish
    # (approx vrcp + Newton step) and the softplus/tanh reference formulation.
    assert jnp.allclose(out, ref, atol=1e-4, rtol=1e-4), "mismatch vs reference"

    print("KERNEL_OK")
</pallas_src>

<mosaic_0001>
module attributes {stable_mosaic.version = 11 : i64} {
  func.func @time_embedding_kernel(%arg0: i32, %arg1: memref<8x1xf32, #tpu.memory_space<vmem>>, %arg2: memref<35x32xf32, #tpu.memory_space<vmem>>, %arg3: memref<8x32xf32, #tpu.memory_space<vmem>>) attributes {dimension_semantics = [#tpu.dimension_semantics<parallel>], iteration_bounds = array<i64: 1>, scalar_prefetch = 0 : i64, scratch_operands = 0 : i64, tpu.core_type = #tpu.core_type<tc>, window_params = [{transform_indices = @transform_0, window_bounds = array<i64: 8, 1>}, {pipeline_mode = #tpu.pipeline_mode<synchronous>, transform_indices = @transform_1, window_bounds = array<i64: 35, 32>}, {transform_indices = @transform_2, window_bounds = array<i64: 8, 32>}]} {
    %c0 = arith.constant 0 : index
    %c0_0 = arith.constant 0 : index
    %0 = vector.load %arg1[%c0, %c0_0] : memref<8x1xf32, #tpu.memory_space<vmem>>, vector<8x1xf32>
    %c32 = arith.constant 32 : index
    %c0_1 = arith.constant 0 : index
    %1 = vector.load %arg2[%c32, %c0_1] : memref<35x32xf32, #tpu.memory_space<vmem>>, vector<1x32xf32>
    %c33 = arith.constant 33 : index
    %c0_2 = arith.constant 0 : index
    %2 = vector.load %arg2[%c33, %c0_2] : memref<35x32xf32, #tpu.memory_space<vmem>>, vector<1x32xf32>
    %c34 = arith.constant 34 : index
    %c0_3 = arith.constant 0 : index
    %3 = vector.load %arg2[%c34, %c0_3] : memref<35x32xf32, #tpu.memory_space<vmem>>, vector<1x32xf32>
    %4 = vector.broadcast %0 : vector<8x1xf32> to vector<8x32xf32>
    %5 = vector.broadcast %1 : vector<1x32xf32> to vector<8x32xf32>
    %6 = arith.mulf %4, %5 : vector<8x32xf32>
    %7 = vector.broadcast %2 : vector<1x32xf32> to vector<8x32xf32>
    %8 = arith.addf %6, %7 : vector<8x32xf32>
    %cst = arith.constant 2.000000e+01 : f32
    %9 = vector.broadcast %cst : f32 to vector<8x32xf32>
    %10 = arith.minimumf %8, %9 : vector<8x32xf32>
    %11 = math.exp %10 : vector<8x32xf32>
    %cst_4 = arith.constant 2.000000e+00 : f32
    %12 = vector.broadcast %cst_4 : f32 to vector<8x32xf32>
    %13 = arith.addf %11, %12 : vector<8x32xf32>
    %14 = arith.mulf %11, %13 : vector<8x32xf32>
    %cst_5 = arith.constant 2.000000e+00 : f32
    %15 = vector.broadcast %cst_5 : f32 to vector<8x32xf32>
    %16 = arith.addf %14, %15 : vector<8x32xf32>
    %17 = tpu.reciprocal %16 {approx = true} : vector<8x32xf32> -> vector<8x32xf32>
    %18 = arith.mulf %16, %17 : vector<8x32xf32>
    %cst_6 = arith.constant 2.000000e+00 : f32
    %19 = vector.broadcast %cst_6 : f32 to vector<8x32xf32>
    %20 = arith.subf %19, %18 : vector<8x32xf32>
    %21 = arith.mulf %17, %20 : vector<8x32xf32>
    %cst_7 = arith.constant 2.000000e+01 : f32
    %22 = vector.broadcast %cst_7 : f32 to vector<8x32xf32>
    %23 = arith.cmpf ogt, %8, %22 : vector<8x32xf32>
    %24 = arith.mulf %8, %14 : vector<8x32xf32>
    %25 = arith.mulf %24, %21 : vector<8x32xf32>
    %26 = arith.select %23, %8, %25 : vector<8x32xi1>, vector<8x32xf32>
    %c0_8 = arith.constant 0 : index
    %c0_9 = arith.constant 0 : index
    %27 = vector.load %arg2[%c0_8, %c0_9] : memref<35x32xf32, #tpu.memory_space<vmem>>, vector<32x32xf32>
    %cst_10 = arith.constant dense<0.000000e+00> : vector<8x32xf32>
    %28 = tpu.matmul %26, %27, %cst_10 {dimension_numbers = #tpu.dot_dimension_numbers<[1], [0], [0], [1], [0, 0, 1, 1], [], []>} : vector<8x32xf32>, vector<32x32xf32>, vector<8x32xf32> -> vector<8x32xf32>
    %29 = vector.broadcast %3 : vector<1x32xf32> to vector<8x32xf32>
    %30 = arith.addf %28, %29 : vector<8x32xf32>
    %c0_11 = arith.constant 0 : index
    %c0_12 = arith.constant 0 : index
    %31 = vector.load %arg3[%c0_11, %c0_12] : memref<8x32xf32, #tpu.memory_space<vmem>>, vector<8x32xf32>
    tpu.vector_store %arg3[%c0_11, %c0_12], %30 {strides = array<i32>} : memref<8x32xf32, #tpu.memory_space<vmem>>, vector<8x32xf32>,
    return
  }
  func.func @transform_0(%arg0: i32) -> (i32, i32) {
    %c0_i32 = arith.constant 0 : i32
    %c0_i32_0 = arith.constant 0 : i32
    return %arg0, %c0_i32 : i32, i32
  }
  func.func @transform_1(%arg0: i32) -> (i32, i32) {
    %c0_i32 = arith.constant 0 : i32
    %c0_i32_0 = arith.constant 0 : i32
    %c0_i32_1 = arith.constant 0 : i32
    return %c0_i32, %c0_i32_0 : i32, i32
  }
  func.func @transform_2(%arg0: i32) -> (i32, i32) {
    %c0_i32 = arith.constant 0 : i32
    %c0_i32_0 = arith.constant 0 : i32
    return %arg0, %c0_i32 : i32, i32
  }
}

</mosaic_0001>

<bundles_post_ra>
// kernel: tpu_custom_call.1
= control target key start
LH: loop header
LB: loop body
LE: loop exit
PB: predicated region body
PF: predicated region fallthrough
CT: control target
= control target key end

     0   :  { %v193_v1 = vmov 0   ;;  %s239_s0 = inlined_call_operand.vmem [shape: f32[8,1], index: 0, kind: input, shape index: {}]   ;;  %s240_s1 = inlined_call_operand.vmem [shape: f32[35,32], index: 1, kind: input, shape index: {}]   ;;  %s241_s2 = inlined_call_operand.hbm [shape: f32[8,32], index: 2, kind: output, shape index: {}]  }
   0x1   :  { %v12_v0 = vld [vmem:[%s239_s0] sm:$0xff]  ;;  %166 = vset.pattern.permute.xlu0 %v193_v1 }
   0x2   :  { %7 = vsyncpa [#allocation3], 0  ;;  %18 = vperm.xlu0 %166, %v12_v0   ;;  %v48_v2 = vld [vmem:[%s240_s1 + $0x18] sm:$0xff]  ;;  %v194_v3 = vmov 0.0   ;;  %v47_v4 = vld [vmem:[%s240_s1 + $0x10] sm:$0xff]  ;;  %vm195_vm0 = vmmov 0  }
   0x3   :  { %151 = vmatprep.subr.mxu0 %v194_v3  ;;  %159 = vmatprep.mubr.msk.f32.mxu0 %vm195_vm0, %v194_v3  ;;  %v46_v5 = vld [vmem:[%s240_s1 + $0x8] sm:$0xff]  ;;  %v45_v6 = vld [vmem:[%s240_s1] sm:$0xff]  ;;  %vm53_vm1 = vcmask 261120   ;;  %s196_s24 = smov [#allocation2]  }
   0x4   :  { %152 = vmatpush3.msra.mxu0 %v48_v2  ;;  %v142_v7 = vld [vmem:[%s240_s1 + $0x20] ss:$0 sm:$0xff]  ;;  %v143_v8 = vld [vmem:[%s240_s1 + $0x21] ss:$0 sm:$0xff]  ;;  %v144_v25 = vld [vmem:[%s240_s1 + $0x22] ss:$0 sm:$0xff] }
   0x5   :  { %153 = vmatprep.subr.mxu0 %v194_v3  ;;  %s134_s25 = sshll.u32 %s196_s24, 4  ;;  %s135_s25 = int_to_ptr.vmem [resolvable:$true] %s134_s25 }
   0x6   :  { %154 = vmatpush3.msra.mxu0 %v47_v4  ;;  %s171_s26 = scalar_lea.vmem %s135_s25, 128  ;;  %p176_p1 = scmp.lt.s32.totalorder %s135_s25, %s135_s25 }
   0x7   :  { %155 = vmatprep.subr.mxu0 %v194_v3  ;;  %p172_p0 = scmp.ne.s32.totalorder %s135_s25, %s171_s26  ;;  %p177_p2 = scmp.lt.s32.totalorder %s171_s26, %s171_s26 }
   0x8   :  { %156 = vmatpush3.msra.mxu0 %v46_v5 }
   0x9   :  { %157 = vmatprep.subr.mxu0 %v194_v3  ;;  %p178_p3 = por %p177_p2, %p176_p1 }
   0xa   :  { %158 = vmatpush3.msra.mxu0 %v45_v6 }
   0xb   :  { %p179_p4 = pnand %p178_p3, %p172_p0 }
  0x7d   :  { %v19_v9 = vpop.permute.xlu0 %18 }
  0x7e   :  { %v25_v10 = vmul.f32 %v142_v7, %v19_v9 }
  0x80   :  { %v30_v11 = vadd.f32 %v143_v8, %v25_v10 }
  0x82   :  { %v31_v12 = vmin.f32 %v30_v11, 20.0  ;;  %vm41_vm2 = vcmp.gt.f32.partialorder %v30_v11, 20.0 }
  0x84   :  { %v32_v13 = vmul.f32 1.442695, %v31_v12 }
  0x86   :  { %167 = vpow2.f32 %v32_v13 }
  0x93   :  { %v168_v14 = vpop.eup %167 }
  0x94   :  { %v34_v15 = vadd.f32 2.0, %v168_v14 }
  0x96   :  { %v35_v16 = vmul.f32 %v168_v14, %v34_v15 }
  0x98   :  { %v36_v17 = vadd.f32 2.0, %v35_v16  ;;  %v42_v22 = vmul.f32 %v35_v16, %v30_v11 }
  0x9a   :  { %169 = vrcp.f32 %v36_v17 }
  0xa7   :  { %v170_v18 = vpop.eup %169 }
  0xa8   :  { %v38_v19 = vmul.f32 %v170_v18, %v36_v17 }
  0xaa   :  { %v39_v20 = vsub.f32 2.0, %v38_v19 }
  0xac   :  { %v40_v21 = vmul.f32 %v170_v18, %v39_v20 }
  0xae   :  { %v43_v23 = vmul.f32 %v42_v22, %v40_v21 }
  0xb0   :  { %v44_v24 = vsel %vm41_vm2, %v30_v11, %v43_v23 }
  0xb1   :  { %160 = vmatmul.mubr.msk.f32.vlgmr.msra.gmra.mxu0 %vm53_vm1, %v44_v24 }
 0x171   :  { %v123_v26 = vpop.f32.mrf.mxu0 }
 0x172   :  { %v124_v27 = vadd.f32 %v144_v25, %v123_v26 }
 0x173   :  { %v161_v28 = vpop.f32.mrf.mxu0 }
 0x174   :  { %127 = vst.msk [vmem:[#allocation2] sm:$0xff] %vm53_vm1, %v124_v27 }
 0x175   :  { %182 = shalt.err (!%p179_p4)
}
 0x176   :  { %137 = dma.vmem_to_hbm [thread:$0]  %s135_s25, 128, %s241_s2, [#allocation3]  }
 0x177   :  { %191 = dma.done.wait [#allocation3], 128  }
 0x178   :  { %192 = vsyncadd [#allocation3], 4294967168 }
 0x179   :  { %141 = vsyncpa [#allocation3], 1 }

</bundles_post_ra>
